<compile_context>
chip_gen: v5e
topology: v5e:2x2
jax: 0.10.0
libtpu: 0.0.40
codegen_flags: <defaults>
</compile_context>

<pallas_src>
import functools

import jax
import jax.numpy as jnp
from jax.experimental import pallas as pl
from jax.experimental.pallas import tpu as pltpu


def _mask_enlarger_kernel(aux_ref, x_ref, o_ref, *, W, HWp, hard, soft, use_dilation):
    """Fused hard/soft 3x3 passes on a block of flattened planes.

    aux_ref : VMEM (16, HWp) f32, block-constant auxiliary vectors:
              rows 0..8  -> halo-folded conv weight vectors
                            (wl0, wc0, wr0, wl1, wc1, wr1, wl2, wc2, wr2)
              rows 9..12 -> f32 0/1 masks (left, right, up, down) for dilation
    x_ref   : VMEM (bp, HWp) block of flattened input planes
    o_ref   : VMEM (bp, HWp) block of flattened output planes
    """
    a = aux_ref[...]                                    # (16, HWp) f32
    wl0, wc0, wr0 = a[0:1], a[1:2], a[2:3]
    wl1, wc1, wr1 = a[3:4], a[4:5], a[5:6]
    wl2, wc2, wr2 = a[6:7], a[7:8], a[8:9]
    left_f, right_f, up_f, down_f = a[9:10], a[10:11], a[11:12], a[12:13]

    y = x_ref[...].astype(jnp.float32)                  # cast once per block

    def conv3x3(t):
        # Horizontal taps via lane rolls; halo + plane-pad masks are already
        # folded into the (1, HWp) weight vectors -> no selects.
        sl = pltpu.roll(t, 1, axis=1)                   # t[i, j-1]
        sr = pltpu.roll(t, HWp - 1, axis=1)             # t[i, j+1]
        r0 = sl * wl0 + t * wc0 + sr * wr0              # di=0 terms (pre vertical shift)
        r1 = sl * wl1 + t * wc1 + sr * wr1              # di=1 terms
        r2 = sl * wl2 + t * wc2 + sr * wr2              # di=2 terms (pre vertical shift)
        up = pltpu.roll(r0, W, axis=1)                  # r0[i-1, j] (row 0 folded to 0)
        down = pltpu.roll(r2, HWp - W, axis=1)          # r2[i+1, j] (row H-1 folded to 0)
        return up + r1 + down

    def dilate3x3(b):
        # Binary 3x3 dilation; values are 0/1 and masks are 0/1, so the
        # multiplicative halo masks are exact.
        h = jnp.maximum(b, jnp.maximum(pltpu.roll(b, 1, axis=1) * left_f,
                                       pltpu.roll(b, HWp - 1, axis=1) * right_f))
        return jnp.maximum(h, jnp.maximum(pltpu.roll(h, W, axis=1) * up_f,
                                          pltpu.roll(h, HWp - W, axis=1) * down_f))

    if hard > 0:
        if use_dilation:
            # With strictly positive weights and a non-negative input,
            # conv-then-binarize == binarize-then-dilate (exact 0/1 output).
            y = jnp.where(y != 0, jnp.float32(1.0), jnp.float32(0.0))
            for _ in range(hard):
                y = dilate3x3(y)
        else:
            # Exact fallback: conv, then x[x != 0] = 1 (exact zeros stay zero).
            for _ in range(hard):
                y = conv3x3(y)
                y = jnp.where(y != 0, jnp.float32(1.0), y)
    for _ in range(soft):
        y = conv3x3(y)

    o_ref[...] = y.astype(o_ref.dtype)


def _build_aux(w33, H, W, HWp):
    """Precompute halo-folded weight vectors + dilation masks, shape (16, HWp)."""
    HW = H * W
    lin = jnp.arange(HWp, dtype=jnp.int32)
    col = lin % W
    row = lin // W
    valid = lin < HW                                    # zero out lane padding
    f32 = jnp.float32
    left_f = (valid & (col > 0)).astype(f32)
    right_f = (valid & (col < W - 1)).astype(f32)
    up_f = (valid & (row > 0)).astype(f32)              # output rows >= 1
    down_f = (valid & (row < H - 1)).astype(f32)        # output rows <= H-2
    valid_f = valid.astype(f32)
    w = w33.astype(f32)
    zeros = jnp.zeros((HWp,), f32)
    rows = [
        # r0 feeds the "up" shift: only source rows 0..H-2 are consumed -> fold down_f.
        w[0, 0] * left_f * down_f, w[0, 1] * down_f, w[0, 2] * right_f * down_f,
        # r1 is consumed in place.
        w[1, 0] * left_f * valid_f, w[1, 1] * valid_f, w[1, 2] * right_f * valid_f,
        # r2 feeds the "down" shift: only source rows 1..H-1 are consumed -> fold up_f.
        w[2, 0] * left_f * up_f, w[2, 1] * up_f, w[2, 2] * right_f * up_f,
        # Post-roll masks for the dilation path.
        left_f, right_f, up_f, down_f,
        zeros, zeros, zeros,                             # pad to 16 sublanes
    ]
    return jnp.stack(rows, axis=0)                       # (16, HWp)


def _vmem_capacity_bytes():
    try:
        return int(pltpu.get_tpu_info().vmem_capacity_bytes)
    except Exception:
        return 64 * 1024 * 1024                          # conservative default


def _choose_block_planes(P, HWp, itemsize, two_way, budget_bytes):
    """How many planes (sublane rows) to process per grid step."""
    # Per-plane, per-step VMEM: double-buffered input + output blocks plus
    # roughly 8 live f32 temporaries inside the fused (unrolled) pass chain.
    per_plane = 4 * HWp * itemsize + 8 * HWp * 4
    bp = max(1, int(budget_bytes // per_plane))
    if two_way and P >= 16:
        bp = min(bp, -(-P // 2))                         # >= 2 grid steps for 2 TCs
    bp = min(bp, P)
    if bp < P:
        bp = max(8, (bp // 8) * 8)                       # sublane-aligned blocks
        bp = min(bp, P)
    return int(bp)


def _fused_mask_enlarger(x_nchw, w33, hard, soft, use_dilation):
    N, C, H, W = x_nchw.shape
    P = N * C
    HW = H * W
    HWp = max(128, ((HW + 127) // 128) * 128)            # lane-dense last dim

    planes = x_nchw.reshape(P, HW)                       # contiguous reshape
    if HWp != HW:
        planes = jnp.pad(planes, ((0, 0), (0, HWp - HW)))
    aux = _build_aux(w33, H, W, HWp)

    vmem_bytes = _vmem_capacity_bytes()
    two_way = vmem_bytes <= 80 * 1024 * 1024             # v7x-like: 64 MiB/TC, 2 TCs
    budget = int(vmem_bytes * (0.62 if two_way else 0.68))
    bp = _choose_block_planes(P, HWp, jnp.dtype(x_nchw.dtype).itemsize, two_way, budget)
    G = pl.cdiv(P, bp)
    vmem_limit = int(min(vmem_bytes - 8 * 1024 * 1024, budget + 24 * 1024 * 1024))

    kernel = functools.partial(_mask_enlarger_kernel, W=W, HWp=HWp,
                               hard=hard, soft=soft, use_dilation=use_dilation)
    out = pl.pallas_call(
        kernel,
        out_shape=jax.ShapeDtypeStruct((P, HWp), x_nchw.dtype),
        grid=(G,),
        in_specs=[
            pl.BlockSpec((16, HWp), lambda g: (0, 0)),   # aux vectors (block-constant)
            pl.BlockSpec((bp, HWp), lambda g: (g, 0)),   # plane block
        ],
        out_specs=pl.BlockSpec((bp, HWp), lambda g: (g, 0)),
        compiler_params=pltpu.CompilerParams(
            dimension_semantics=("parallel",),
            vmem_limit_bytes=vmem_limit,
        ),
    )(aux, planes)

    if HWp != HW:
        out = out[:, :HW]
    return out.reshape(N, C, H, W)


def mask_enlarger_forward(x, w33, hard: int = 1, soft: int = 1,
                          assume_nonneg_input: bool = True):
    """Replicates Mask_Enlarger.forward semantics."""
    hard = int(hard)
    soft = int(soft)
    if hard + soft <= 1:
        # The PyTorch module returns `input` here; skip the launch entirely.
        return x
    use_dilation = False
    if hard > 0 and assume_nonneg_input:
        try:
            # Dilation shortcut is exact only for strictly positive weights
            # (and non-negative mask inputs); otherwise use the conv fallback.
            use_dilation = bool(jnp.all(w33 > 0))
        except Exception:
            use_dilation = False
    return _fused_mask_enlarger(x, w33, hard, soft, use_dilation)


def _reference_forward(x, w, hard, soft):
    """Pure-JAX reference mirroring the PyTorch module (validation only)."""
    if hard + soft <= 1:
        return x
    H, W = x.shape[-2:]

    def conv(t):
        tp = jnp.pad(t, ((0, 0), (0, 0), (1, 1), (1, 1)))
        acc = jnp.zeros(t.shape, jnp.float32)
        for di in range(3):
            for dj in range(3):
                acc = acc + w[di, dj] * tp[:, :, di:di + H, dj:dj + W].astype(jnp.float32)
        return acc.astype(t.dtype)

    y = x
    for _ in range(max(hard, 0)):
        y = conv(y)
        y = jnp.where(y != 0, jnp.asarray(1.0, y.dtype), y)
    for _ in range(max(soft, 0)):
        y = conv(y)
    return y


if __name__ == "__main__":
    # Conv2d(1, 1, 3, 1, 1, bias=False) weight filled with 1/9.
    weight = jnp.full((3, 3), 1.0 / 9.0, dtype=jnp.float32)

    # Small deterministic binary mask, NCHW with C=1 (the module is 1->1 chan).
    key = jax.random.PRNGKey(0)
    N, C, H, W = 4, 1, 16, 16
    mask = (jax.random.uniform(key, (N, C, H, W)) > 0.7).astype(jnp.float32)

    # Default path (dilation hard passes + folded-weight conv soft passes).
    out = jax.block_until_ready(mask_enlarger_forward(mask, weight, hard=1, soft=1))
    assert out.shape == (N, C, H, W) and out.dtype == jnp.float32
    ref = _reference_forward(mask, weight, 1, 1)
    assert jnp.allclose(out, ref, atol=1e-5, rtol=1e-5), "hard=1/soft=1 mismatch"

    # Multi-pass config exercises repeated dilation + repeated conv.
    out2 = jax.block_until_ready(mask_enlarger_forward(mask, weight, hard=2, soft=2))
    ref2 = _reference_forward(mask, weight, 2, 2)
    assert jnp.allclose(out2, ref2, atol=1e-5, rtol=1e-5), "hard=2/soft=2 mismatch"

    # Exact conv+binarize fallback path (no dilation shortcut).
    out3 = jax.block_until_ready(
        mask_enlarger_forward(mask, weight, hard=1, soft=1, assume_nonneg_input=False))
    assert jnp.allclose(out3, ref, atol=1e-5, rtol=1e-5), "conv-fallback mismatch"

    # hard + soft <= 1: module returns its input; no kernel launch happens.
    assert mask_enlarger_forward(mask, weight, hard=1, soft=0) is mask

    print("KERNEL_OK")
</pallas_src>

<mosaic_0001>
module attributes {stable_mosaic.version = 11 : i64} {
  func.func @_mask_enlarger_kernel(%arg0: i32, %arg1: memref<16x256xf32, #tpu.memory_space<vmem>>, %arg2: memref<4x256xf32, #tpu.memory_space<vmem>>, %arg3: memref<4x256xf32, #tpu.memory_space<vmem>>) attributes {dimension_semantics = [#tpu.dimension_semantics<parallel>], iteration_bounds = array<i64: 1>, scalar_prefetch = 0 : i64, scratch_operands = 0 : i64, tpu.core_type = #tpu.core_type<tc>, window_params = [{pipeline_mode = #tpu.pipeline_mode<synchronous>, transform_indices = @transform_0, window_bounds = array<i64: 16, 256>}, {transform_indices = @transform_1, window_bounds = array<i64: 4, 256>}, {transform_indices = @transform_2, window_bounds = array<i64: 4, 256>}]} {
    %c0 = arith.constant 0 : index
    %c0_0 = arith.constant 0 : index
    %0 = vector.load %arg1[%c0, %c0_0] : memref<16x256xf32, #tpu.memory_space<vmem>>, vector<16x256xf32>
    %1 = vector.extract_strided_slice %0 {offsets = [0, 0], sizes = [1, 256], strides = [1, 1]} : vector<16x256xf32> to vector<1x256xf32>
    %2 = vector.extract_strided_slice %0 {offsets = [1, 0], sizes = [1, 256], strides = [1, 1]} : vector<16x256xf32> to vector<1x256xf32>
    %3 = vector.extract_strided_slice %0 {offsets = [2, 0], sizes = [1, 256], strides = [1, 1]} : vector<16x256xf32> to vector<1x256xf32>
    %4 = vector.extract_strided_slice %0 {offsets = [3, 0], sizes = [1, 256], strides = [1, 1]} : vector<16x256xf32> to vector<1x256xf32>
    %5 = vector.extract_strided_slice %0 {offsets = [4, 0], sizes = [1, 256], strides = [1, 1]} : vector<16x256xf32> to vector<1x256xf32>
    %6 = vector.extract_strided_slice %0 {offsets = [5, 0], sizes = [1, 256], strides = [1, 1]} : vector<16x256xf32> to vector<1x256xf32>
    %7 = vector.extract_strided_slice %0 {offsets = [6, 0], sizes = [1, 256], strides = [1, 1]} : vector<16x256xf32> to vector<1x256xf32>
    %8 = vector.extract_strided_slice %0 {offsets = [7, 0], sizes = [1, 256], strides = [1, 1]} : vector<16x256xf32> to vector<1x256xf32>
    %9 = vector.extract_strided_slice %0 {offsets = [8, 0], sizes = [1, 256], strides = [1, 1]} : vector<16x256xf32> to vector<1x256xf32>
    %10 = vector.extract_strided_slice %0 {offsets = [9, 0], sizes = [1, 256], strides = [1, 1]} : vector<16x256xf32> to vector<1x256xf32>
    %11 = vector.extract_strided_slice %0 {offsets = [10, 0], sizes = [1, 256], strides = [1, 1]} : vector<16x256xf32> to vector<1x256xf32>
    %12 = vector.extract_strided_slice %0 {offsets = [11, 0], sizes = [1, 256], strides = [1, 1]} : vector<16x256xf32> to vector<1x256xf32>
    %13 = vector.extract_strided_slice %0 {offsets = [12, 0], sizes = [1, 256], strides = [1, 1]} : vector<16x256xf32> to vector<1x256xf32>
    %c0_1 = arith.constant 0 : index
    %c0_2 = arith.constant 0 : index
    %14 = vector.load %arg2[%c0_1, %c0_2] : memref<4x256xf32, #tpu.memory_space<vmem>>, vector<4x256xf32>
    %cst = arith.constant 0.000000e+00 : f32
    %15 = vector.broadcast %cst : f32 to vector<4x256xf32>
    %16 = arith.cmpf one, %14, %15 : vector<4x256xf32>
    %cst_3 = arith.constant 1.000000e+00 : f32
    %cst_4 = arith.constant 0.000000e+00 : f32
    %17 = vector.broadcast %cst_3 : f32 to vector<4x256xf32>
    %18 = vector.broadcast %cst_4 : f32 to vector<4x256xf32>
    %19 = arith.select %16, %17, %18 : vector<4x256xi1>, vector<4x256xf32>
    %c1_i32 = arith.constant 1 : i32
    %20 = tpu.dynamic_rotate %19 by %c1_i32 dim 1 : vector<4x256xf32>, i32 -> vector<4x256xf32>
    %21 = vector.broadcast %10 : vector<1x256xf32> to vector<4x256xf32>
    %22 = arith.mulf %20, %21 : vector<4x256xf32>
    %c255_i32 = arith.constant 255 : i32
    %23 = tpu.dynamic_rotate %19 by %c255_i32 dim 1 : vector<4x256xf32>, i32 -> vector<4x256xf32>
    %24 = vector.broadcast %11 : vector<1x256xf32> to vector<4x256xf32>
    %25 = arith.mulf %23, %24 : vector<4x256xf32>
    %26 = arith.maximumf %22, %25 : vector<4x256xf32>
    %27 = arith.maximumf %19, %26 : vector<4x256xf32>
    %c16_i32 = arith.constant 16 : i32
    %28 = tpu.dynamic_rotate %27 by %c16_i32 dim 1 : vector<4x256xf32>, i32 -> vector<4x256xf32>
    %29 = vector.broadcast %12 : vector<1x256xf32> to vector<4x256xf32>
    %30 = arith.mulf %28, %29 : vector<4x256xf32>
    %c240_i32 = arith.constant 240 : i32
    %31 = tpu.dynamic_rotate %27 by %c240_i32 dim 1 : vector<4x256xf32>, i32 -> vector<4x256xf32>
    %32 = vector.broadcast %13 : vector<1x256xf32> to vector<4x256xf32>
    %33 = arith.mulf %31, %32 : vector<4x256xf32>
    %34 = arith.maximumf %30, %33 : vector<4x256xf32>
    %35 = arith.maximumf %27, %34 : vector<4x256xf32>
    %c1_i32_5 = arith.constant 1 : i32
    %36 = tpu.dynamic_rotate %35 by %c1_i32_5 dim 1 : vector<4x256xf32>, i32 -> vector<4x256xf32>
    %c255_i32_6 = arith.constant 255 : i32
    %37 = tpu.dynamic_rotate %35 by %c255_i32_6 dim 1 : vector<4x256xf32>, i32 -> vector<4x256xf32>
    %38 = vector.broadcast %1 : vector<1x256xf32> to vector<4x256xf32>
    %39 = arith.mulf %36, %38 : vector<4x256xf32>
    %40 = vector.broadcast %2 : vector<1x256xf32> to vector<4x256xf32>
    %41 = arith.mulf %35, %40 : vector<4x256xf32>
    %42 = arith.addf %39, %41 : vector<4x256xf32>
    %43 = vector.broadcast %3 : vector<1x256xf32> to vector<4x256xf32>
    %44 = arith.mulf %37, %43 : vector<4x256xf32>
    %45 = arith.addf %42, %44 : vector<4x256xf32>
    %46 = vector.broadcast %4 : vector<1x256xf32> to vector<4x256xf32>
    %47 = arith.mulf %36, %46 : vector<4x256xf32>
    %48 = vector.broadcast %5 : vector<1x256xf32> to vector<4x256xf32>
    %49 = arith.mulf %35, %48 : vector<4x256xf32>
    %50 = arith.addf %47, %49 : vector<4x256xf32>
    %51 = vector.broadcast %6 : vector<1x256xf32> to vector<4x256xf32>
    %52 = arith.mulf %37, %51 : vector<4x256xf32>
    %53 = arith.addf %50, %52 : vector<4x256xf32>
    %54 = vector.broadcast %7 : vector<1x256xf32> to vector<4x256xf32>
    %55 = arith.mulf %36, %54 : vector<4x256xf32>
    %56 = vector.broadcast %8 : vector<1x256xf32> to vector<4x256xf32>
    %57 = arith.mulf %35, %56 : vector<4x256xf32>
    %58 = arith.addf %55, %57 : vector<4x256xf32>
    %59 = vector.broadcast %9 : vector<1x256xf32> to vector<4x256xf32>
    %60 = arith.mulf %37, %59 : vector<4x256xf32>
    %61 = arith.addf %58, %60 : vector<4x256xf32>
    %c16_i32_7 = arith.constant 16 : i32
    %62 = tpu.dynamic_rotate %45 by %c16_i32_7 dim 1 : vector<4x256xf32>, i32 -> vector<4x256xf32>
    %c240_i32_8 = arith.constant 240 : i32
    %63 = tpu.dynamic_rotate %61 by %c240_i32_8 dim 1 : vector<4x256xf32>, i32 -> vector<4x256xf32>
    %64 = arith.addf %62, %53 : vector<4x256xf32>
    %65 = arith.addf %64, %63 : vector<4x256xf32>
    %c0_9 = arith.constant 0 : index
    %c0_10 = arith.constant 0 : index
    %66 = vector.load %arg3[%c0_9, %c0_10] : memref<4x256xf32, #tpu.memory_space<vmem>>, vector<4x256xf32>
    tpu.vector_store %arg3[%c0_9, %c0_10], %65 {strides = array<i32>} : memref<4x256xf32, #tpu.memory_space<vmem>>, vector<4x256xf32>,
    return
  }
  func.func @transform_0(%arg0: i32) -> (i32, i32) {
    %c0_i32 = arith.constant 0 : i32
    %c0_i32_0 = arith.constant 0 : i32
    %c0_i32_1 = arith.constant 0 : i32
    return %c0_i32, %c0_i32_0 : i32, i32
  }
  func.func @transform_1(%arg0: i32) -> (i32, i32) {
    %c0_i32 = arith.constant 0 : i32
    %c0_i32_0 = arith.constant 0 : i32
    return %arg0, %c0_i32 : i32, i32
  }
  func.func @transform_2(%arg0: i32) -> (i32, i32) {
    %c0_i32 = arith.constant 0 : i32
    %c0_i32_0 = arith.constant 0 : i32
    return %arg0, %c0_i32 : i32, i32
  }
}

</mosaic_0001>

<bundles_post_ra>
// kernel: tpu_custom_call.1
= control target key start
LH: loop header
LB: loop body
LE: loop exit
PB: predicated region body
PF: predicated region fallthrough
CT: control target
= control target key end

     0   :  { %7 = vsyncpa [#allocation3], 0  ;;  %s490_s0 = inlined_call_operand.hbm [shape: f32[16,256], index: 0, kind: input, shape index: {}]   ;;  %s491_s1 = inlined_call_operand.hbm [shape: f32[4,256], index: 1, kind: input, shape index: {}]   ;;  %s492_s2 = inlined_call_operand.hbm [shape: f32[4,256], index: 2, kind: output, shape index: {}]  }
   0x1   :  { %8 = vsyncpa [#allocation6], 0 }
   0x2   :  { %9 = vsyncpa [#allocation4], 0  ;;  %s14_s11 = sshll.u32 %s490_s0, 4  ;;  %s362_s12 = smov [#allocation2]   ;;  %s15_s11 = int_to_ptr.hbm [resolvable:$true] %s14_s11 }
   0x3   :  { %s16_s13 = sshll.u32 %s362_s12, 4  ;;  %s28_s16 = sshll.u32 %s491_s1, 4  ;;  %s17_s13 = int_to_ptr.vmem [resolvable:$true] %s16_s13  ;;  %s29_s16 = int_to_ptr.hbm [resolvable:$true] %s28_s16 }
   0x4   :  { %s363_s17 = smov 256   ;;  %s364_s18 = smov 16  }
   0x5   :  { %22 = dma.hbm_to_vmem [thread:$0]  %s15_s11, 512, %s17_s13, [#allocation3], %s363_s17, %s363_s17, %s364_s18  }
   0x6   :  { %s365_s19 = smov [#allocation5]  }
   0x7   :  { %s30_s20 = sshll.u32 %s365_s19, 4  ;;  %s31_s20 = int_to_ptr.vmem [resolvable:$true] %s30_s20 }
   0x8   :  { %33 = dma.hbm_to_vmem [thread:$0]  %s29_s16, 128, %s31_s20, [#allocation6]  }
   0x9   :  { %356 = dma.done.wait [#allocation3], 512  }
   0xa   :  { %357 = vsyncadd [#allocation3], 4294966784 }
   0xb   :  { %358 = dma.done.wait [#allocation6], 128  }
   0xc   :  { %359 = vsyncadd [#allocation6], 4294967168  ;;  %v46_v0 = vld [vmem:[#allocation5] sm:$0xff]  ;;  %v366_v1 = vmov 0.0   ;;  %s367_s0 = smov 1   ;;  %s368_s1 = smov 127   ;;  %v59_v8 = vlaneseq }
   0xd   :  { %vm47_vm0 = vcmp.ne.f32.partialorder %v46_v0, 0.0  ;;  %v399_v11 = vld [vmem:[#allocation2 + $0x18] sm:$0xff]  ;;  %v402_v13 = vld [vmem:[#allocation2 + $0x10] sm:$0xff]  ;;  %vm89_vm3 = vcmask 1043456   ;;  %s369_s21 = smov 112   ;;  %v437_v57 = vld [vmem:[#allocation2 + $0x8] sm:$0xff] }
   0xe   :  { %v48_v2 = vsel %vm47_vm0, 1.0, %v366_v1  ;;  %v397_v9 = vand.u32 127, %v59_v8  ;;  %v65_v14 = vperm.slane %v399_v11, 1  ;;  %v80_v15 = vperm.slane %v402_v13, 2  ;;  %v440_v59 = vld [vmem:[#allocation2] sm:$0xff]  ;;  %s370_s22 = smov [#allocation7]  }
   0xf   :  { %50 = vst [vmem:[#allocation1] ss:$2 sm:$0xff] %v48_v2  ;;  %v81_v16 = vperm.slane %v399_v11, 2  ;;  %v64_v18 = vperm.slane %v402_v13, 1  ;;  %v107_v38 = vperm.slane %v399_v11, 3  ;;  %v122_v39 = vperm.slane %v402_v13, 4 }
  0x10   :  { %vm61_vm1 = vcmp.lt.s32.totalorder %v397_v9, 1  ;;  %vm77_vm2 = vcmp.lt.s32.totalorder %v397_v9, 127  ;;  %vm103_vm4 = vcmp.lt.s32.totalorder %v397_v9, 16  ;;  %vm119_vm5 = vcmp.lt.s32.totalorder %v397_v9, 112  ;;  %s262_s23 = sshll.u32 %s370_s22, 4  ;;  %s264_s26 = sshll.u32 %s492_s2, 4  ;;  %s263_s23 = int_to_ptr.vmem [resolvable:$true] %s262_s23  ;;  %s265_s26 = int_to_ptr.hbm [resolvable:$true] %s264_s26 }
  0x11   :  { %v123_v40 = vperm.slane %v399_v11, 4  ;;  %v106_v43 = vperm.slane %v402_v13, 3  ;;  %v162_v58 = vperm.slane %v437_v57, 1  ;;  %v161_v60 = vperm.slane %v440_v59, 1 }
  0x12   :  { %v188_v0 = vperm.slane %v437_v57, 4 }
  0x13   :  { %v165_v61 = vrot.slane %v162_v58, 4  ;;  %v230_v58 = vperm.slane %v399_v11, 0 }
  0x15   :  { %v166_v1 = vsel %vm89_vm3, %v161_v60, %v165_v61 }
  0x16   :  { %v51_v3 = vld.sshfl [vmem:[#allocation1] sm:$0xff pattern:$0x75316420]  ;;  %v52_v4 = vld.sshfl [vmem:[#allocation1 + $0x8] sm:$0xff pattern:$0x75316420] }
  0x17   :  { %55 = vrot.lane.b32.xlu0 %v51_v3, %s367_s0  ;;  %68 = vst [vmem:[#allocation1] ss:$2 sm:$0xff] %v48_v2  ;;  %v187_v3 = vperm.slane %v440_v59, 4 }
  0x1e   :  { %v69_v5 = vld.sshfl [vmem:[#allocation1] sm:$0xff pattern:$0x75316420]  ;;  %v70_v6 = vld.sshfl [vmem:[#allocation1 + $0x8] sm:$0xff pattern:$0x75316420] }
  0x1f   :  { %57 = vrot.lane.b32.xlu0 %v52_v4, %s367_s0  ;;  %73 = vrot.lane.b32.xlu1 %v69_v5, %s368_s1  ;;  %v191_v4 = vrot.slane %v188_v0, 4 }
  0x21   :  { %v192_v8 = vsel %vm89_vm3, %v187_v3, %v191_v4 }
  0x27   :  { %75 = vrot.lane.b32.xlu1 %v70_v6, %s368_s1 }
  0x89   :  { %v56_v7 = vpop.permute.xlu0 %55 }
  0x91   :  { %v74_v10 = vpop.permute.xlu1 %73  ;;  %v58_v12 = vpop.permute.xlu0 %57 }
  0x92   :  { %v62_v17 = vsel %vm61_vm1, %v56_v7, %v58_v12  ;;  %v63_v20 = vsel %vm61_vm1, %v58_v12, %v56_v7  ;;  %v214_v7 = vperm.slane %v437_v57, 7  ;;  %v213_v12 = vperm.slane %v440_v59, 7 }
  0x93   :  { %v67_v23 = vmul.f32 %v65_v14, %v62_v17  ;;  %v66_v26 = vmul.f32 %v64_v18, %v63_v20 }
  0x94   :  { %v217_v14 = vrot.slane %v214_v7, 4 }
  0x96   :  { %v218_v17 = vsel %vm89_vm3, %v213_v12, %v217_v14 }
  0x99   :  { %v76_v19 = vpop.permute.xlu1 %75 }
  0x9a   :  { %v78_v21 = vsel %vm77_vm2, %v74_v10, %v76_v19  ;;  %v79_v22 = vsel %vm77_vm2, %v76_v19, %v74_v10 }
  0x9b   :  { %v82_v24 = vmul.f32 %v80_v15, %v78_v21  ;;  %v83_v25 = vmul.f32 %v81_v16, %v79_v22 }
  0x9d   :  { %v85_v27 = vmax.f32 %v67_v23, %v83_v25  ;;  %v84_v28 = vmax.f32 %v66_v26, %v82_v24  ;;  %v183_v23 = vperm.slane %v440_v59, 3  ;;  %v184_v24 = vperm.slane %v437_v57, 3 }
  0x9f   :  { %v88_v29 = vrot.slane %v85_v27, 4  ;;  %v209_v27 = vperm.slane %v440_v59, 6 }
  0xa1   :  { %v90_v30 = vsel %vm89_vm3, %v84_v28, %v88_v29  ;;  %v157_v28 = vperm.slane %v440_v59, 0  ;;  %v158_v29 = vperm.slane %v437_v57, 0 }
  0xa2   :  { %v92_v31 = vmax.f32 %v48_v2, %v90_v30 }
  0xa4   :  { %94 = vst [vmem:[#allocation1] ss:$2 sm:$0xff] %v92_v31 }
  0xab   :  { %v95_v32 = vld.sshfl [vmem:[#allocation1] sm:$0xff pattern:$0x75316420]  ;;  %v96_v33 = vld.sshfl [vmem:[#allocation1 + $0x8] sm:$0xff pattern:$0x75316420] }
  0xac   :  { %99 = vrot.lane.b32.xlu2 %v95_v32, %s364_s18  ;;  %110 = vst [vmem:[#allocation1] ss:$2 sm:$0xff] %v92_v31 }
  0xb3   :  { %v112_v34 = vld.sshfl [vmem:[#allocation1 + $0x8] sm:$0xff pattern:$0x75316420]  ;;  %v111_v35 = vld.sshfl [vmem:[#allocation1] sm:$0xff pattern:$0x75316420] }
  0xb4   :  { %101 = vrot.lane.b32.xlu2 %v96_v33, %s364_s18  ;;  %117 = vrot.lane.b32.xlu1 %v112_v34, %s369_s21  ;;  %v229_v33 = vperm.slane %v402_v13, 0  ;;  %v203_v34 = vperm.slane %v440_v59, 5 }
  0xb5   :  { %115 = vrot.lane.b32.xlu0 %v111_v35, %s369_s21  ;;  %v204_v35 = vperm.slane %v437_v57, 5 }
 0x106   :  { %v100_v36 = vpop.permute.xlu2 %99 }
 0x10e   :  { %v102_v37 = vpop.permute.xlu2 %101 }
 0x10f   :  { %v104_v41 = vsel %vm103_vm4, %v100_v36, %v102_v37  ;;  %v105_v45 = vsel %vm103_vm4, %v102_v37, %v100_v36 }
 0x110   :  { %v109_v48 = vmul.f32 %v107_v38, %v104_v41  ;;  %v108_v51 = vmul.f32 %v106_v43, %v105_v45  ;;  %v178_v38 = vperm.slane %v437_v57, 2  ;;  %v210_v41 = vperm.slane %v437_v57, 6 }
 0x126   :  { %v118_v42 = vpop.permute.xlu1 %117 }
 0x127   :  { %v116_v44 = vpop.permute.xlu0 %115 }
 0x128   :  { %v120_v46 = vsel %vm119_vm5, %v116_v44, %v118_v42  ;;  %v121_v47 = vsel %vm119_vm5, %v118_v42, %v116_v44 }
 0x129   :  { %v124_v49 = vmul.f32 %v122_v39, %v120_v46  ;;  %v125_v50 = vmul.f32 %v123_v40, %v121_v47  ;;  %v177_v39 = vperm.slane %v440_v59, 2 }
 0x12b   :  { %v127_v52 = vmax.f32 %v109_v48, %v125_v50  ;;  %v126_v53 = vmax.f32 %v108_v51, %v124_v49 }
 0x12d   :  { %v130_v54 = vrot.slane %v127_v52, 4 }
 0x12f   :  { %v131_v55 = vsel %vm89_vm3, %v126_v53, %v130_v54 }
 0x130   :  { %v133_v56 = vmax.f32 %v92_v31, %v131_v55 }
 0x132   :  { %135 = vst [vmem:[#allocation1] ss:$2 sm:$0xff] %v133_v56  ;;  %v168_v2 = vmul.f32 %v166_v1, %v133_v56  ;;  %v194_v10 = vmul.f32 %v192_v8, %v133_v56  ;;  %v220_v18 = vmul.f32 %v218_v17, %v133_v56 }
 0x139   :  { %v137_v62 = vld.sshfl [vmem:[#allocation1 + $0x8] sm:$0xff pattern:$0x75316420]  ;;  %v136_v63 = vld.sshfl [vmem:[#allocation1] sm:$0xff pattern:$0x75316420] }
 0x13a   :  { %142 = vrot.lane.b32.xlu0 %v137_v62, %s367_s0  ;;  %140 = vrot.lane.b32.xlu2 %v136_v63, %s367_s0  ;;  %146 = vst [vmem:[#allocation1] ss:$2 sm:$0xff] %v133_v56 }
 0x141   :  { %v148_v5 = vld.sshfl [vmem:[#allocation1 + $0x8] sm:$0xff pattern:$0x75316420]  ;;  %v147_v6 = vld.sshfl [vmem:[#allocation1] sm:$0xff pattern:$0x75316420] }
 0x142   :  { %153 = vrot.lane.b32.xlu2 %v148_v5, %s368_s1  ;;  %151 = vrot.lane.b32.xlu1 %v147_v6, %s368_s1  ;;  %170 = vst [vmem:[#allocation1] ss:$2 sm:$0xff] %v168_v2 }
 0x149   :  { %v171_v15 = vld.sshfl [vmem:[#allocation1] sm:$0xff pattern:$0x75316420]  ;;  %v172_v16 = vld.sshfl [vmem:[#allocation1 + $0x8] sm:$0xff pattern:$0x75316420] }
 0x14a   :  { %196 = vst [vmem:[#allocation1] ss:$2 sm:$0xff] %v194_v10 }
 0x151   :  { %v197_v19 = vld.sshfl [vmem:[#allocation1] sm:$0xff pattern:$0x75316420]  ;;  %v198_v20 = vld.sshfl [vmem:[#allocation1 + $0x8] sm:$0xff pattern:$0x75316420] }
 0x152   :  { %222 = vst [vmem:[#allocation1] ss:$2 sm:$0xff] %v220_v18 }
 0x159   :  { %v223_v44 = vld.sshfl [vmem:[#allocation1] sm:$0xff pattern:$0x75316420]  ;;  %v224_v63 = vld.sshfl [vmem:[#allocation1 + $0x8] sm:$0xff pattern:$0x75316420] }
 0x194   :  { %v141_v21 = vpop.permute.xlu2 %140 }
 0x19c   :  { %v154_v40 = vpop.permute.xlu2 %153 }
 0x1ac   :  { %v143_v22 = vpop.permute.xlu0 %142 }
 0x1ad   :  { %v144_v25 = vsel %vm61_vm1, %v141_v21, %v143_v22  ;;  %v145_v26 = vsel %vm61_vm1, %v143_v22, %v141_v21 }
 0x1ae   :  { %v185_v30 = vmul.f32 %v183_v23, %v145_v26  ;;  %v186_v31 = vmul.f32 %v184_v24, %v144_v25  ;;  %v211_v32 = vmul.f32 %v209_v27, %v145_v26  ;;  %v159_v36 = vmul.f32 %v157_v28, %v145_v26 }
 0x1af   :  { %v160_v37 = vmul.f32 %v158_v29, %v144_v25  ;;  %v212_v61 = vmul.f32 %v210_v41, %v144_v25 }
 0x1b0   :  { %v201_v45 = vadd.f32 %v197_v19, %v185_v30  ;;  %v202_v46 = vadd.f32 %v198_v20, %v186_v31  ;;  %v227_v50 = vadd.f32 %v223_v44, %v211_v32  ;;  %v175_v53 = vadd.f32 %v171_v15, %v159_v36 }
 0x1b1   :  { %v176_v51 = vadd.f32 %v172_v16, %v160_v37  ;;  %v228_v0 = vadd.f32 %v224_v63, %v212_v61 }
 0x1b4   :  { %v152_v42 = vpop.permute.xlu1 %151 }
 0x1b5   :  { %v155_v43 = vsel %vm77_vm2, %v152_v42, %v154_v40  ;;  %v156_v13 = vsel %vm77_vm2, %v154_v40, %v152_v42 }
 0x1b6   :  { %v205_v47 = vmul.f32 %v203_v34, %v155_v43  ;;  %v206_v48 = vmul.f32 %v204_v35, %v156_v13  ;;  %v231_v49 = vmul.f32 %v229_v33, %v155_v43  ;;  %v180_v52 = vmul.f32 %v178_v38, %v156_v13 }
 0x1b7   :  { %v179_v54 = vmul.f32 %v177_v39, %v155_v43  ;;  %v232_v62 = vmul.f32 %v230_v58, %v156_v13 }
 0x1b8   :  { %v233_v55 = vadd.f32 %v231_v49, %v227_v50  ;;  %v207_v56 = vadd.f32 %v205_v47, %v201_v45  ;;  %v208_v57 = vadd.f32 %v206_v48, %v202_v46  ;;  %v182_v59 = vadd.f32 %v180_v52, %v176_v51 }
 0x1b9   :  { %v181_v60 = vadd.f32 %v179_v54, %v175_v53  ;;  %v234_v1 = vadd.f32 %v232_v62, %v228_v0 }
 0x1ba   :  { %241 = vrot.lane.b32.xlu2 %v233_v55, %s369_s21  ;;  %237 = vrot.lane.b32.xlu1 %v182_v59, %s364_s18 }
 0x1bb   :  { %235 = vrot.lane.b32.xlu0 %v181_v60, %s364_s18 }
 0x1c3   :  { %243 = vrot.lane.b32.xlu0 %v234_v1, %s369_s21 }
 0x214   :  { %v242_v5 = vpop.permute.xlu2 %241 }
 0x22c   :  { %v238_v3 = vpop.permute.xlu1 %237 }
 0x22d   :  { %v236_v2 = vpop.permute.xlu0 %235 }
 0x22e   :  { %v239_v11 = vsel %vm103_vm4, %v236_v2, %v238_v3  ;;  %v240_v4 = vsel %vm103_vm4, %v238_v3, %v236_v2 }
 0x22f   :  { %v248_v6 = vadd.f32 %v239_v11, %v208_v57  ;;  %v247_v12 = vadd.f32 %v240_v4, %v207_v56 }
 0x235   :  { %v244_v7 = vpop.permute.xlu0 %243 }
 0x236   :  { %v245_v8 = vsel %vm119_vm5, %v242_v5, %v244_v7  ;;  %v246_v10 = vsel %vm119_vm5, %v244_v7, %v242_v5 }
 0x237   :  { %v250_v14 = vadd.f32 %v248_v6, %v246_v10  ;;  %v249_v15 = vadd.f32 %v247_v12, %v245_v8 }
 0x239   :  { %v253_v16 = vrot.slane %v250_v14, 4 }
 0x23b   :  { %v254_v17 = vsel %vm89_vm3, %v249_v15, %v253_v16 }
 0x23c   :  { %256 = vst [vmem:[#allocation7] sm:$0xff] %v254_v17 }
 0x23d   :  { %267 = dma.vmem_to_hbm [thread:$0]  %s263_s23, 128, %s265_s26, [#allocation4]  }
 0x23e   :  { %360 = dma.done.wait [#allocation4], 128  }
 0x23f   :  { %361 = vsyncadd [#allocation4], 4294967168 }
 0x240   :  { %272 = vsyncpa [#allocation3], 1 }
 0x241   :  { %273 = vsyncpa [#allocation6], 1 }
 0x242   :  { %274 = vsyncpa [#allocation4], 1 }

</bundles_post_ra>
